<compile_context>
chip_gen: v6e
topology: v6e:2x2x1
jax: 0.10.0
libtpu: 0.0.40
codegen_flags: <defaults>
</compile_context>

<pallas_src>
import functools

import jax
import jax.numpy as jnp
from jax.experimental import pallas as pl
from jax.experimental.pallas import tpu as pltpu

_LANE = 128
_VMEM_LIMIT = 48 * 1024 * 1024        # <= v7x 64 MiB/TC; well under v5e/v6e 128 MiB
_Z_RESIDENT_BYTES = 8 * 1024 * 1024   # conservative so resident-Z also fits on v7x


def _round_up(x, m):
    return ((x + m - 1) // m) * m


def _pick_tile(n_p):
    """Row/K tile: close to 512, divides n_p, >=2 row tiles when n_p >= 256 (v7x megacore)."""
    if n_p <= 128:
        return n_p
    tm = min(512, max(128, ((n_p // 2) // 128) * 128))
    while n_p % tm:
        tm -= 128
    return tm


# ---------------------------------------------------------------------------
# Kernel 1: row-tiled feature transform  Z1 = X @ W1   (weight VMEM-resident)
# ---------------------------------------------------------------------------
def _xw_kernel(x_ref, w_ref, o_ref):
    o_ref[...] = jnp.dot(
        x_ref[...], w_ref[...], preferred_element_type=jnp.float32
    ).astype(o_ref.dtype)


def feature_transform(x, w, *, tm, out_dtype):
    n, f = x.shape
    h = w.shape[1]
    # TODO(synk): add a K-tile grid axis + f32 accumulator here for very large feature
    # dims (f_p in the thousands) so X row block + resident W stay inside v7x VMEM.
    return pl.pallas_call(
        _xw_kernel,
        out_shape=jax.ShapeDtypeStruct((n, h), out_dtype),
        grid=(n // tm,),
        in_specs=[
            pl.BlockSpec((tm, f), lambda i: (i, 0)),
            pl.BlockSpec((f, h), lambda i: (0, 0)),     # resident weight
        ],
        out_specs=pl.BlockSpec((tm, h), lambda i: (i, 0)),
        compiler_params=pltpu.CompilerParams(
            dimension_semantics=("parallel",),
            vmem_limit_bytes=_VMEM_LIMIT,
        ),
        cost_estimate=pl.CostEstimate(
            flops=2 * n * f * h,
            transcendentals=0,
            bytes_accessed=(n * f + f * h) * 4 + n * h * jnp.dtype(out_dtype).itemsize,
        ),
    )(x, w)


# ---------------------------------------------------------------------------
# Kernel 2: layer-1 propagation, fused with the layer-2 feature transform.
#   h1 = relu(A_hat @ Z1 + b1)    (accumulated directly in the h1 output block)
#   z2 = h1 @ W2                  (free MXU filler in a memory-bound kernel)
#   grid = (row tiles [parallel], K tiles over A_hat columns [arbitrary])
# ---------------------------------------------------------------------------
def _prop1_kernel(a_ref, z_ref, b_ref, w2_ref, h1_ref, z2_ref, *, tk, z_resident):
    k = pl.program_id(1)

    @pl.when(k == 0)
    def _():
        h1_ref[...] = jnp.zeros_like(h1_ref)

    if z_resident:
        z = z_ref[pl.ds(pl.multiple_of(k * tk, tk), tk), :]
    else:
        z = z_ref[...]
    # A and Z come in already in their (possibly narrow) storage dtype -> f32 accumulate.
    h1_ref[...] += jnp.dot(a_ref[...], z, preferred_element_type=jnp.float32)

    @pl.when(k == pl.num_programs(1) - 1)
    def _():
        h1 = jnp.maximum(h1_ref[...] + b_ref[...], 0.0)
        h1_ref[...] = h1
        z2_ref[...] = jnp.dot(
            h1.astype(w2_ref.dtype), w2_ref[...], preferred_element_type=jnp.float32
        ).astype(z2_ref.dtype)


def gcn_layer1(a_hat, z1, b1, w2, *, tm, tk):
    n = a_hat.shape[0]
    h = z1.shape[1]
    z_bytes = z1.size * z1.dtype.itemsize
    z_resident = z_bytes <= _Z_RESIDENT_BYTES
    z_spec = (pl.BlockSpec((n, h), lambda i, k: (0, 0)) if z_resident
              else pl.BlockSpec((tk, h), lambda i, k: (k, 0)))
    kernel = functools.partial(_prop1_kernel, tk=tk, z_resident=z_resident)
    z_reads = 1 if z_resident else (n // tm)
    return pl.pallas_call(
        kernel,
        out_shape=(jax.ShapeDtypeStruct((n, h), jnp.float32),
                   jax.ShapeDtypeStruct((n, h), z1.dtype)),
        grid=(n // tm, n // tk),
        in_specs=[
            pl.BlockSpec((tm, tk), lambda i, k: (i, k)),   # A_hat tile (streamed)
            z_spec,                                        # Z1 (resident or K-tiled)
            pl.BlockSpec((1, h), lambda i, k: (0, 0)),     # bias resident
            pl.BlockSpec((h, h), lambda i, k: (0, 0)),     # W2 resident
        ],
        out_specs=(
            pl.BlockSpec((tm, h), lambda i, k: (i, 0)),    # h1 (doubles as accumulator)
            pl.BlockSpec((tm, h), lambda i, k: (i, 0)),    # z2 = h1 @ W2
        ),
        compiler_params=pltpu.CompilerParams(
            dimension_semantics=("parallel", "arbitrary"),
            vmem_limit_bytes=_VMEM_LIMIT,
        ),
        cost_estimate=pl.CostEstimate(
            flops=2 * n * n * h + 2 * n * h * h,
            transcendentals=0,
            bytes_accessed=(n * n * a_hat.dtype.itemsize
                            + z_reads * n * h * z1.dtype.itemsize
                            + n * h * (4 + z1.dtype.itemsize)
                            + h * h * w2.dtype.itemsize),
        ),
    )(a_hat, z1, b1, w2)


# ---------------------------------------------------------------------------
# Kernel 3: layer-2 propagation fused with JK(max) + Linear head.
#   h2  = relu(A_hat @ Z2 + b2)        (f32 VMEM scratch; never written to HBM)
#   out = max(h1, h2) @ Wfc + bfc
# ---------------------------------------------------------------------------
def _prop2_kernel(a_ref, z_ref, b_ref, h1_ref, wfc_ref, bfc_ref, o_ref, acc_ref,
                  *, tk, z_resident):
    k = pl.program_id(1)

    @pl.when(k == 0)
    def _():
        acc_ref[...] = jnp.zeros_like(acc_ref)

    if z_resident:
        z = z_ref[pl.ds(pl.multiple_of(k * tk, tk), tk), :]
    else:
        z = z_ref[...]
    acc_ref[...] += jnp.dot(a_ref[...], z, preferred_element_type=jnp.float32)

    @pl.when(k == pl.num_programs(1) - 1)
    def _():
        h2 = jnp.maximum(acc_ref[...] + b_ref[...], 0.0)
        hj = jnp.maximum(h1_ref[...], h2)                  # JumpingKnowledge('max')
        o_ref[...] = (
            jnp.dot(hj, wfc_ref[...], preferred_element_type=jnp.float32) + bfc_ref[...]
        )


def gcn_layer2_head(a_hat, z2, b2, h1, wfc, bfc, *, tm, tk):
    n = a_hat.shape[0]
    h = z2.shape[1]
    c = wfc.shape[1]
    z_bytes = z2.size * z2.dtype.itemsize
    z_resident = z_bytes <= _Z_RESIDENT_BYTES
    z_spec = (pl.BlockSpec((n, h), lambda i, k: (0, 0)) if z_resident
              else pl.BlockSpec((tk, h), lambda i, k: (k, 0)))
    kernel = functools.partial(_prop2_kernel, tk=tk, z_resident=z_resident)
    z_reads = 1 if z_resident else (n // tm)
    return pl.pallas_call(
        kernel,
        out_shape=jax.ShapeDtypeStruct((n, c), jnp.float32),
        grid=(n // tm, n // tk),
        in_specs=[
            pl.BlockSpec((tm, tk), lambda i, k: (i, k)),   # A_hat tile (streamed)
            z_spec,                                        # Z2 (resident or K-tiled)
            pl.BlockSpec((1, h), lambda i, k: (0, 0)),     # b2 resident
            pl.BlockSpec((tm, h), lambda i, k: (i, 0)),    # h1 row tile (once per i)
            pl.BlockSpec((h, c), lambda i, k: (0, 0)),     # Wfc resident
            pl.BlockSpec((1, c), lambda i, k: (0, 0)),     # bfc resident
        ],
        out_specs=pl.BlockSpec((tm, c), lambda i, k: (i, 0)),
        scratch_shapes=[pltpu.VMEM((tm, h), jnp.float32)],
        compiler_params=pltpu.CompilerParams(
            dimension_semantics=("parallel", "arbitrary"),
            vmem_limit_bytes=_VMEM_LIMIT,
        ),
        cost_estimate=pl.CostEstimate(
            flops=2 * n * n * h + 2 * n * h * c + n * h,
            transcendentals=0,
            bytes_accessed=(n * n * a_hat.dtype.itemsize
                            + z_reads * n * h * z2.dtype.itemsize
                            + n * h * 4 + h * c * 4 + n * c * 4),
        ),
    )(a_hat, z2, b2, h1, wfc, bfc)


# ---------------------------------------------------------------------------
# Glue: dense normalized adjacency built directly at the padded node count
# ---------------------------------------------------------------------------
def build_normalized_adjacency(edge_index, num_nodes, padded_nodes):
    """Dense D^{-1/2}(A+I)D^{-1/2} (PyG gcn_norm, add_self_loops=True) at padded size."""
    src, dst = edge_index[0], edge_index[1]
    a = jnp.zeros((padded_nodes, padded_nodes), jnp.float32)
    a = a.at[dst, src].add(1.0)                       # aggregate at the target node
    a = jnp.where(a > 0, 1.0, 0.0)
    # TODO(synk): PyG sums duplicate-edge weights; the dedup above matches simple graphs.
    real = (jnp.arange(padded_nodes) < num_nodes).astype(jnp.float32)
    a = a + jnp.diag(real)                            # self-loops only on real nodes
    deg = a.sum(axis=1)
    deg_safe = jnp.where(deg > 0.0, deg, 1.0)
    dinv = jnp.where(deg > 0.0, 1.0 / jnp.sqrt(deg_safe), 0.0)
    return dinv[:, None] * a * dinv[None, :]


# ---------------------------------------------------------------------------
# Full JK forward (padding + dispatch)
# ---------------------------------------------------------------------------
def jk_forward(x, edge_index, w1, b1, w2, b2, wfc, bfc, *,
               storage_dtype=jnp.bfloat16):
    n, f = x.shape
    h = w1.shape[1]
    c = wfc.shape[1]

    n_p = _round_up(n, _LANE)
    f_p = _round_up(f, _LANE)
    h_p = _round_up(h, _LANE)
    c_p = _round_up(c, _LANE)
    tile = _pick_tile(n_p)

    # A_hat built directly at the padded size (no jnp.pad of an N^2 array) and stored
    # in storage_dtype (bf16 halves the dominant HBM stream; accumulation stays f32).
    a_p = build_normalized_adjacency(edge_index, n, n_p).astype(storage_dtype)

    def pad2(m, rows, cols, dtype=jnp.float32):
        return jnp.pad(m.astype(dtype), ((0, rows - m.shape[0]), (0, cols - m.shape[1])))

    x_p = pad2(x, n_p, f_p)
    w1_p = pad2(w1, f_p, h_p)
    w2_p = pad2(w2, h_p, h_p, storage_dtype)
    wfc_p = pad2(wfc, h_p, c_p)
    b1_p = jnp.pad(b1.astype(jnp.float32), (0, h_p - h))[None, :]
    b2_p = jnp.pad(b2.astype(jnp.float32), (0, h_p - h))[None, :]
    bfc_p = jnp.pad(bfc.astype(jnp.float32), (0, c_p - c))[None, :]

    # Layer 1: feature transform, then fused (propagate + bias + ReLU + layer-2 transform).
    z1 = feature_transform(x_p, w1_p, tm=tile, out_dtype=storage_dtype)
    h1, z2 = gcn_layer1(a_p, z1, b1_p, w2_p, tm=tile, tk=tile)

    # Layer 2: propagation fused with JK(max) + Linear head (h2 never touches HBM).
    out_p = gcn_layer2_head(a_p, z2, b2_p, h1, wfc_p, bfc_p, tm=tile, tk=tile)
    return out_p[:n, :c]


def glorot(key, shape):
    fan_in, fan_out = shape[0], shape[1]
    limit = jnp.sqrt(6.0 / (fan_in + fan_out))
    return jax.random.uniform(key, shape, jnp.float32, -limit, limit)


if __name__ == "__main__":
    # Small deterministic problem: N nodes, nfeat -> nhid -> nclass.
    N, nfeat, nhid, nclass = 16, 8, 32, 4

    key = jax.random.PRNGKey(0)
    k_x, k_e, k_w1, k_w2, k_wfc = jax.random.split(key, 5)

    # Node features.
    x = jax.random.normal(k_x, (N, nfeat), jnp.float32)

    # Deterministic edge_index [2, E]: ring plus a few extra edges (both directions).
    ring_src = jnp.arange(N, dtype=jnp.int32)
    ring_dst = (ring_src + 1) % N
    rnd_src = jax.random.randint(k_e, (8,), 0, N, dtype=jnp.int32)
    rnd_dst = (rnd_src + 3) % N
    src = jnp.concatenate([ring_src, ring_dst, rnd_src, rnd_dst])
    dst = jnp.concatenate([ring_dst, ring_src, rnd_dst, rnd_src])
    edge_index = jnp.stack([src, dst], axis=0)

    # Parameters: Xavier/glorot uniform weights, zero biases (matches weights_init).
    w1 = glorot(k_w1, (nfeat, nhid))
    b1 = jnp.zeros((nhid,), jnp.float32)
    w2 = glorot(k_w2, (nhid, nhid))
    b2 = jnp.zeros((nhid,), jnp.float32)
    wfc = glorot(k_wfc, (nhid, nclass))
    bfc = jnp.zeros((nclass,), jnp.float32)

    # Plain-JAX reference (same math as the PyTorch module, float32).
    a_ref_mat = build_normalized_adjacency(edge_index, N, N)
    h1_ref = jnp.maximum(a_ref_mat @ (x @ w1) + b1, 0.0)
    h2_ref = jnp.maximum(a_ref_mat @ (h1_ref @ w2) + b2, 0.0)
    ref = jnp.maximum(h1_ref, h2_ref) @ wfc + bfc

    # Exact-precision path (f32 storage everywhere).
    out_f32 = jax.block_until_ready(
        jk_forward(x, edge_index, w1, b1, w2, b2, wfc, bfc,
                   storage_dtype=jnp.float32))
    assert out_f32.shape == (N, nclass)
    assert jnp.allclose(out_f32, ref, atol=1e-3, rtol=1e-3)

    # Bandwidth-optimized path (bf16 A_hat / Z / W2 in HBM, f32 MXU accumulation).
    out_bf16 = jax.block_until_ready(
        jk_forward(x, edge_index, w1, b1, w2, b2, wfc, bfc,
                   storage_dtype=jnp.bfloat16))
    assert out_bf16.shape == (N, nclass)
    assert jnp.allclose(out_bf16, ref, atol=5e-2, rtol=5e-2)

    print("KERNEL_OK")
</pallas_src>

<mosaic_0001>
module attributes {stable_mosaic.version = 11 : i64} {
  func.func @_xw_kernel(%arg0: i32, %arg1: memref<128x128xf32, #tpu.memory_space<vmem>>, %arg2: memref<128x128xf32, #tpu.memory_space<vmem>>, %arg3: memref<128x128xf32, #tpu.memory_space<vmem>>) attributes {dimension_semantics = [#tpu.dimension_semantics<parallel>], iteration_bounds = array<i64: 1>, scalar_prefetch = 0 : i64, scratch_operands = 0 : i64, tpu.core_type = #tpu.core_type<tc>, window_params = [{transform_indices = @transform_0, window_bounds = array<i64: 128, 128>}, {pipeline_mode = #tpu.pipeline_mode<synchronous>, transform_indices = @transform_1, window_bounds = array<i64: 128, 128>}, {transform_indices = @transform_2, window_bounds = array<i64: 128, 128>}]} {
    %c0 = arith.constant 0 : index
    %c0_0 = arith.constant 0 : index
    %0 = vector.load %arg1[%c0, %c0_0] : memref<128x128xf32, #tpu.memory_space<vmem>>, vector<128x128xf32>
    %c0_1 = arith.constant 0 : index
    %c0_2 = arith.constant 0 : index
    %1 = vector.load %arg2[%c0_1, %c0_2] : memref<128x128xf32, #tpu.memory_space<vmem>>, vector<128x128xf32>
    %cst = arith.constant dense<0.000000e+00> : vector<128x128xf32>
    %2 = tpu.matmul %0, %1, %cst {dimension_numbers = #tpu.dot_dimension_numbers<[1], [0], [0], [1], [0, 0, 1, 1], [], []>} : vector<128x128xf32>, vector<128x128xf32>, vector<128x128xf32> -> vector<128x128xf32>
    %c0_3 = arith.constant 0 : index
    %c0_4 = arith.constant 0 : index
    %3 = vector.load %arg3[%c0_3, %c0_4] : memref<128x128xf32, #tpu.memory_space<vmem>>, vector<128x128xf32>
    tpu.vector_store %arg3[%c0_3, %c0_4], %2 {strides = array<i32>} : memref<128x128xf32, #tpu.memory_space<vmem>>, vector<128x128xf32>,
    return
  }
  func.func @transform_0(%arg0: i32) -> (i32, i32) {
    %c0_i32 = arith.constant 0 : i32
    %c0_i32_0 = arith.constant 0 : i32
    return %arg0, %c0_i32 : i32, i32
  }
  func.func @transform_1(%arg0: i32) -> (i32, i32) {
    %c0_i32 = arith.constant 0 : i32
    %c0_i32_0 = arith.constant 0 : i32
    %c0_i32_1 = arith.constant 0 : i32
    return %c0_i32, %c0_i32_0 : i32, i32
  }
  func.func @transform_2(%arg0: i32) -> (i32, i32) {
    %c0_i32 = arith.constant 0 : i32
    %c0_i32_0 = arith.constant 0 : i32
    return %arg0, %c0_i32 : i32, i32
  }
}

</mosaic_0001>

<bundles_post_ra>
// kernel: tpu_custom_call.1
= control target key start
LH: loop header
LB: loop body
LE: loop exit
PB: predicated region body
PF: predicated region fallthrough
CT: control target
= control target key end

     0   :  { %7 = vsyncpa [#allocation3], 0  ;;  %s480_s0 = inlined_call_operand.hbm [shape: f32[128,128], index: 0, kind: input, shape index: {}]   ;;  %s481_s1 = inlined_call_operand.hbm [shape: f32[128,128], index: 1, kind: input, shape index: {}]   ;;  %s482_s2 = inlined_call_operand.hbm [shape: f32[128,128], index: 2, kind: output, shape index: {}]  }
   0x1   :  { %8 = vsyncpa [#allocation6], 0 }
   0x2   :  { %9 = vsyncpa [#allocation4], 0  ;;  %s442_s9 = smov [#allocation2]  }
   0x3   :  { %s15_s10 = sshll.u32 %s442_s9, 4  ;;  %s16_s10 = int_to_ptr.vmem [resolvable:$true] %s15_s10 }
   0x4   :  { %s384_s11 = scalar_lea.vmem %s16_s10, 2048  ;;  %p389_p1 = scmp.lt.s32.totalorder %s16_s10, %s16_s10 }
   0x5   :  { %p385_p0 = scmp.ne.s32.totalorder %s16_s10, %s384_s11  ;;  %p390_p2 = scmp.lt.s32.totalorder %s384_s11, %s384_s11 }
   0x7   :  { %p391_p3 = por %p390_p2, %p389_p1 }
   0x9   :  { %p392_p4 = pnand %p391_p3, %p385_p0 }
   0xb   :  { %395 = shalt.err (!%p392_p4)
}
   0xc   :  { %s443_s12 = smov 128   ;;  %s444_s13 = smov 8  }
   0xd   :  { %21 = dma.hbm_to_vmem [thread:$0]  %s480_s0, 2048, %s16_s10, [#allocation3], %s443_s12, %s443_s12, %s444_s13  }
   0xe   :  { %s445_s16 = smov [#allocation5]  }
   0xf   :  { %s27_s17 = sshll.u32 %s445_s16, 4  ;;  %s28_s17 = int_to_ptr.vmem [resolvable:$true] %s27_s17 }
  0x10   :  { %s404_s18 = scalar_lea.vmem %s28_s17, 2048  ;;  %p409_p6 = scmp.lt.s32.totalorder %s28_s17, %s28_s17 }
  0x11   :  { %p405_p5 = scmp.ne.s32.totalorder %s28_s17, %s404_s18  ;;  %p410_p7 = scmp.lt.s32.totalorder %s404_s18, %s404_s18 }
  0x13   :  { %p411_p8 = por %p410_p7, %p409_p6 }
  0x15   :  { %p412_p9 = pnand %p411_p8, %p405_p5 }
  0x17   :  { %415 = shalt.err (!%p412_p9)
}
  0x18   :  { %33 = dma.hbm_to_vmem [thread:$0]  %s481_s1, 2048, %s28_s17, [#allocation6], %s443_s12, %s443_s12, %s444_s13  }
  0x19   :  { %436 = dma.done.wait [#allocation3], 2048  }
  0x1a   :  { %437 = vsyncadd [#allocation3], 4294965248 }
  0x1b   :  { %438 = dma.done.wait [#allocation6], 2048  }
  0x1c   :  { %439 = vsyncadd [#allocation6], 4294965248  ;;  %v71_v0 = vld [vmem:[#allocation5 + $0x78] sm:$0xff]  ;;  %v70_v1 = vld [vmem:[#allocation5 + $0x70] sm:$0xff]  ;;  %s446_s0 = smov [#allocation7]  }
  0x1d   :  { %283 = vmatprep.subr.mxu0 %v71_v0  ;;  %339 = vmatprep.subr.mxu1 %v71_v0  ;;  %v69_v2 = vld [vmem:[#allocation5 + $0x68] sm:$0xff]  ;;  %v68_v3 = vld [vmem:[#allocation5 + $0x60] sm:$0xff]  ;;  %v67_v4 = vld [vmem:[#allocation5 + $0x58] sm:$0xff]  ;;  %s238_s1 = sshll.u32 %s446_s0, 4  ;;  %s239_s1 = int_to_ptr.vmem [resolvable:$true] %s238_s1 }
  0x1e   :  { %284 = vmatpush3.msra.mxu0 %v71_v0  ;;  %355 = vmatpush3.msra.mxu1 %v71_v0  ;;  %v66_v5 = vld [vmem:[#allocation5 + $0x50] sm:$0xff]  ;;  %v65_v6 = vld [vmem:[#allocation5 + $0x48] sm:$0xff]  ;;  %v64_v7 = vld [vmem:[#allocation5 + $0x40] sm:$0xff]  ;;  %s416_s21 = scalar_lea.vmem %s239_s1, 2048  ;;  %p421_p11 = scmp.lt.s32.totalorder %s239_s1, %s239_s1 }
  0x1f   :  { %285 = vmatprep.subr.mxu0 %v70_v1  ;;  %340 = vmatprep.subr.mxu1 %v70_v1  ;;  %v63_v8 = vld [vmem:[#allocation5 + $0x38] sm:$0xff]  ;;  %v62_v9 = vld [vmem:[#allocation5 + $0x30] sm:$0xff]  ;;  %v61_v10 = vld [vmem:[#allocation5 + $0x28] sm:$0xff]  ;;  %p417_p10 = scmp.ne.s32.totalorder %s239_s1, %s416_s21  ;;  %p422_p12 = scmp.lt.s32.totalorder %s416_s21, %s416_s21 }
  0x20   :  { %286 = vmatpush3.msra.mxu0 %v70_v1  ;;  %356 = vmatpush3.msra.mxu1 %v70_v1  ;;  %v60_v11 = vld [vmem:[#allocation5 + $0x20] sm:$0xff]  ;;  %v59_v12 = vld [vmem:[#allocation5 + $0x18] sm:$0xff]  ;;  %v58_v13 = vld [vmem:[#allocation5 + $0x10] sm:$0xff] }
  0x21   :  { %287 = vmatprep.subr.mxu0 %v69_v2  ;;  %341 = vmatprep.subr.mxu1 %v69_v2  ;;  %v57_v14 = vld [vmem:[#allocation5 + $0x8] sm:$0xff]  ;;  %v56_v15 = vld [vmem:[#allocation5] sm:$0xff]  ;;  %v42_v20 = vld [vmem:[#allocation2 + $0x10] sm:$0xff]  ;;  %p423_p13 = por %p422_p12, %p421_p11 }
  0x22   :  { %288 = vmatpush3.msra.mxu0 %v69_v2  ;;  %357 = vmatpush3.msra.mxu1 %v69_v2  ;;  %v40_v16 = vld [vmem:[#allocation2] sm:$0xff]  ;;  %v41_v18 = vld [vmem:[#allocation2 + $0x8] sm:$0xff]  ;;  %v50_v21 = vld [vmem:[#allocation2 + $0x50] sm:$0xff] }
  0x23   :  { %289 = vmatprep.subr.mxu0 %v68_v3  ;;  %342 = vmatprep.subr.mxu1 %v68_v3  ;;  %v48_v17 = vld [vmem:[#allocation2 + $0x40] sm:$0xff]  ;;  %v49_v19 = vld [vmem:[#allocation2 + $0x48] sm:$0xff]  ;;  %v43_v22 = vld [vmem:[#allocation2 + $0x18] sm:$0xff]  ;;  %p424_p0 = pnand %p423_p13, %p417_p10 }
  0x24   :  { %290 = vmatpush3.msra.mxu0 %v68_v3  ;;  %358 = vmatpush3.msra.mxu1 %v68_v3  ;;  %v51_v23 = vld [vmem:[#allocation2 + $0x58] sm:$0xff]  ;;  %v44_v24 = vld [vmem:[#allocation2 + $0x20] sm:$0xff]  ;;  %v45_v26 = vld [vmem:[#allocation2 + $0x28] sm:$0xff] }
  0x25   :  { %291 = vmatprep.subr.mxu0 %v67_v4  ;;  %343 = vmatprep.subr.mxu1 %v67_v4  ;;  %v52_v25 = vld [vmem:[#allocation2 + $0x60] sm:$0xff]  ;;  %v53_v27 = vld [vmem:[#allocation2 + $0x68] sm:$0xff]  ;;  %v46_v28 = vld [vmem:[#allocation2 + $0x30] sm:$0xff] }
  0x26   :  { %292 = vmatpush3.msra.mxu0 %v67_v4  ;;  %359 = vmatpush3.msra.mxu1 %v67_v4  ;;  %v54_v29 = vld [vmem:[#allocation2 + $0x70] sm:$0xff]  ;;  %v47_v30 = vld [vmem:[#allocation2 + $0x38] sm:$0xff] }
  0x27   :  { %293 = vmatprep.subr.mxu0 %v66_v5  ;;  %344 = vmatprep.subr.mxu1 %v66_v5  ;;  %v55_v31 = vld [vmem:[#allocation2 + $0x78] sm:$0xff] }
  0x28   :  { %294 = vmatpush3.msra.mxu0 %v66_v5  ;;  %360 = vmatpush3.msra.mxu1 %v66_v5 }
  0x29   :  { %295 = vmatprep.subr.mxu0 %v65_v6  ;;  %345 = vmatprep.subr.mxu1 %v65_v6 }
  0x2a   :  { %296 = vmatpush3.msra.mxu0 %v65_v6  ;;  %361 = vmatpush3.msra.mxu1 %v65_v6 }
  0x2b   :  { %297 = vmatprep.subr.mxu0 %v64_v7  ;;  %346 = vmatprep.subr.mxu1 %v64_v7 }
  0x2c   :  { %298 = vmatpush3.msra.mxu0 %v64_v7  ;;  %362 = vmatpush3.msra.mxu1 %v64_v7 }
  0x2d   :  { %299 = vmatprep.subr.mxu0 %v63_v8  ;;  %347 = vmatprep.subr.mxu1 %v63_v8 }
  0x2e   :  { %300 = vmatpush3.msra.mxu0 %v63_v8  ;;  %363 = vmatpush3.msra.mxu1 %v63_v8 }
  0x2f   :  { %301 = vmatprep.subr.mxu0 %v62_v9  ;;  %348 = vmatprep.subr.mxu1 %v62_v9 }
  0x30   :  { %302 = vmatpush3.msra.mxu0 %v62_v9  ;;  %364 = vmatpush3.msra.mxu1 %v62_v9 }
  0x31   :  { %303 = vmatprep.subr.mxu0 %v61_v10  ;;  %349 = vmatprep.subr.mxu1 %v61_v10 }
  0x32   :  { %304 = vmatpush3.msra.mxu0 %v61_v10  ;;  %365 = vmatpush3.msra.mxu1 %v61_v10 }
  0x33   :  { %305 = vmatprep.subr.mxu0 %v60_v11  ;;  %350 = vmatprep.subr.mxu1 %v60_v11 }
  0x34   :  { %306 = vmatpush3.msra.mxu0 %v60_v11  ;;  %366 = vmatpush3.msra.mxu1 %v60_v11 }
  0x35   :  { %307 = vmatprep.subr.mxu0 %v59_v12  ;;  %351 = vmatprep.subr.mxu1 %v59_v12 }
  0x36   :  { %308 = vmatpush3.msra.mxu0 %v59_v12  ;;  %367 = vmatpush3.msra.mxu1 %v59_v12 }
  0x37   :  { %309 = vmatprep.subr.mxu0 %v58_v13  ;;  %352 = vmatprep.subr.mxu1 %v58_v13 }
  0x38   :  { %310 = vmatpush3.msra.mxu0 %v58_v13  ;;  %368 = vmatpush3.msra.mxu1 %v58_v13 }
  0x39   :  { %311 = vmatprep.subr.mxu0 %v57_v14  ;;  %353 = vmatprep.subr.mxu1 %v57_v14 }
  0x3a   :  { %312 = vmatpush3.msra.mxu0 %v57_v14  ;;  %369 = vmatpush3.msra.mxu1 %v57_v14 }
  0x3b   :  { %313 = vmatprep.subr.mxu0 %v56_v15  ;;  %354 = vmatprep.subr.mxu1 %v56_v15 }
  0x3c   :  { %314 = vmatpush3.msra.mxu0 %v56_v15  ;;  %370 = vmatpush3.msra.mxu1 %v56_v15 }
  0x3d   :  { %315 = vmatprep.mubr.f32.mxu0 %v40_v16  ;;  %327 = vmatprep.mubr.f32.mxu1 %v48_v17 }
  0x3e   :  { %316 = vmatmul.mubr.f32.vlgmr.msra.gmra.mxu0 %v41_v18  ;;  %328 = vmatmul.mubr.f32.vlgmr.msra.gmra.mxu1 %v49_v19 }
  0x3f   :  { %318 = vmatprep.mubr.f32.mxu0 %v42_v20  ;;  %330 = vmatprep.mubr.f32.mxu1 %v50_v21 }
  0x42   :  { %319 = vmatmul.mubr.f32.gmra.mxu0 %v43_v22  ;;  %331 = vmatmul.mubr.f32.gmra.mxu1 %v51_v23 }
  0x43   :  { %321 = vmatprep.mubr.f32.mxu0 %v44_v24  ;;  %333 = vmatprep.mubr.f32.mxu1 %v52_v25 }
  0x46   :  { %322 = vmatmul.mubr.f32.gmra.mxu0 %v45_v26  ;;  %334 = vmatmul.mubr.f32.gmra.mxu1 %v53_v27 }
  0x47   :  { %324 = vmatprep.mubr.f32.mxu0 %v46_v28  ;;  %336 = vmatprep.mubr.f32.mxu1 %v54_v29 }
  0x4a   :  { %325 = vmatmul.mubr.f32.gmra.mxu0 %v47_v30  ;;  %337 = vmatmul.mubr.f32.gmra.mxu1 %v55_v31 }
  0xfe   :  { %v317_v32 = vpop.f32.mrf.mxu0  ;;  %v329_v33 = vpop.f32.mrf.mxu1 }
  0xff   :  { %218 = vst [vmem:[#allocation7 + $0x8] sm:$0xff] %v317_v32  ;;  %226 = vst [vmem:[#allocation7 + $0x48] sm:$0xff] %v329_v33 }
 0x100   :  { %v138_v34 = vpop.f32.mrf.mxu0  ;;  %v178_v35 = vpop.f32.mrf.mxu1 }
 0x101   :  { %217 = vst [vmem:[#allocation7] sm:$0xff] %v138_v34  ;;  %225 = vst [vmem:[#allocation7 + $0x40] sm:$0xff] %v178_v35 }
 0x102   :  { %v320_v36 = vpop.f32.mrf.mxu0  ;;  %v332_v37 = vpop.f32.mrf.mxu1 }
 0x103   :  { %220 = vst [vmem:[#allocation7 + $0x18] sm:$0xff] %v320_v36  ;;  %228 = vst [vmem:[#allocation7 + $0x58] sm:$0xff] %v332_v37 }
 0x104   :  { %v148_v38 = vpop.f32.mrf.mxu0  ;;  %v188_v39 = vpop.f32.mrf.mxu1 }
 0x105   :  { %219 = vst [vmem:[#allocation7 + $0x10] sm:$0xff] %v148_v38  ;;  %227 = vst [vmem:[#allocation7 + $0x50] sm:$0xff] %v188_v39 }
 0x106   :  { %v323_v40 = vpop.f32.mrf.mxu0  ;;  %v335_v41 = vpop.f32.mrf.mxu1 }
 0x107   :  { %222 = vst [vmem:[#allocation7 + $0x28] sm:$0xff] %v323_v40  ;;  %230 = vst [vmem:[#allocation7 + $0x68] sm:$0xff] %v335_v41 }
 0x108   :  { %v158_v42 = vpop.f32.mrf.mxu0  ;;  %v198_v43 = vpop.f32.mrf.mxu1 }
 0x109   :  { %221 = vst [vmem:[#allocation7 + $0x20] sm:$0xff] %v158_v42  ;;  %229 = vst [vmem:[#allocation7 + $0x60] sm:$0xff] %v198_v43 }
 0x10a   :  { %v326_v44 = vpop.f32.mrf.mxu0  ;;  %v338_v45 = vpop.f32.mrf.mxu1 }
 0x10b   :  { %224 = vst [vmem:[#allocation7 + $0x38] sm:$0xff] %v326_v44  ;;  %232 = vst [vmem:[#allocation7 + $0x78] sm:$0xff] %v338_v45 }
 0x10c   :  { %v168_v46 = vpop.f32.mrf.mxu0  ;;  %v208_v47 = vpop.f32.mrf.mxu1 }
 0x10d   :  { %223 = vst [vmem:[#allocation7 + $0x30] sm:$0xff] %v168_v46  ;;  %231 = vst [vmem:[#allocation7 + $0x70] sm:$0xff] %v208_v47 }
 0x10e   :  { %427 = shalt.err (!%p424_p0)
}
 0x10f   :  { %244 = dma.vmem_to_hbm [thread:$0]  %s239_s1, 2048, %s482_s2, [#allocation4], %s443_s12, %s443_s12, %s444_s13  }
 0x110   :  { %440 = dma.done.wait [#allocation4], 2048  }
 0x111   :  { %441 = vsyncadd [#allocation4], 4294965248 }
 0x112   :  { %248 = vsyncpa [#allocation3], 1 }
 0x113   :  { %249 = vsyncpa [#allocation6], 1 }
 0x114   :  { %250 = vsyncpa [#allocation4], 1 }

</bundles_post_ra>
